<compile_context>
chip_gen: v5e
topology: v5e:2x2
jax: 0.10.0
libtpu: 0.0.40
codegen_flags: <defaults>
</compile_context>

<pallas_src>
import functools

import jax
import jax.numpy as jnp
from jax import lax
from jax.experimental import pallas as pl
from jax.experimental.pallas import tpu as pltpu


def _round_up(n, m):
    return ((n + m - 1) // m) * m


def _sine_act_kernel(x_ref, w_ref, b_ref, o_ref, *, H):
    # x_ref: (tile_n, C)          w_ref: (C, tile_ch) block-diagonal slice
    # b_ref: (1, tile_ch)         o_ref: (tile_n, tile_ch)
    tile_ch = o_ref.shape[-1]

    # Single MXU matmul produces the whole lane-dense output slab for this tile.
    f = jnp.dot(x_ref[...], w_ref[...],
                preferred_element_type=jnp.float32,
                precision=lax.Precision.HIGHEST) + b_ref[...]

    # Hoisted mask over global column index: sin on the first H-1 columns of each
    # H-group, identity on the last column of each group.
    col = (pl.program_id(1) * tile_ch
           + lax.broadcasted_iota(jnp.int32, (1, tile_ch), 1))
    keep_sin = (col % H) != (H - 1)
    o_ref[...] = jnp.where(keep_sin, jnp.sin(f), f).astype(o_ref.dtype)


def sine_activation(x, weight, bias, *, out_dtype=jnp.float32):
    """x: (B, T, C); weight: (H, 1) (nn.Linear(1, H).weight); bias: (H,).

    Returns (B, T, C*H).  Pass out_dtype=jnp.bfloat16 to halve HBM store traffic
    (recommended on v5e/v6e when the consumer tolerates bf16).
    """
    B, T, C = x.shape
    H = int(weight.shape[0])
    CH = C * H
    N = B * T
    out_bytes = jnp.dtype(out_dtype).itemsize

    # ---- column tiling: lane-dense, multiple of 128, own grid axis if large ----
    CH_pad = _round_up(CH, 128)
    k = CH_pad // 128
    d = max(dd for dd in (4, 3, 2, 1) if k % dd == 0)   # largest divisor -> tile_ch <= 512
    tile_ch = 128 * d

    # ---- row tiling: VMEM-budgeted, large for HBM-roofline, >= ~8 grid steps ----
    # (tile_n, C) input block is lane-padded to 128 in VMEM -> 512 B/row/buffer.
    VMEM_BUDGET = 24 * 1024 * 1024
    per_row = 2 * (128 * 4 + tile_ch * out_bytes)        # double-buffered in + out
    max_rows = max(8, (VMEM_BUDGET // per_row) // 8 * 8)
    tile_n = max(8, min(8192, max_rows, _round_up(pl.cdiv(N, 8), 8)))

    grid = (pl.cdiv(N, tile_n), CH_pad // tile_ch)

    # vmem limit from actual footprint (+ tiny W/bias buffers + headroom).
    vmem_bytes = tile_n * per_row
    vmem_bytes += 2 * _round_up(C, 8) * tile_ch * 4      # w_blk, double-buffered
    vmem_bytes += 2 * 8 * tile_ch * 4                    # bias,  double-buffered
    vmem_limit = int(min(max(vmem_bytes + (2 << 20), 16 * 1024 * 1024),
                         64 * 1024 * 1024))

    # ---- wrapper-side constants (tiny); no row padding / no output row slice ----
    x2d = x.reshape(N, C).astype(jnp.float32)

    w_vec = weight.reshape(H).astype(jnp.float32)
    w_blk = (jnp.eye(C, dtype=jnp.float32)[:, :, None]
             * w_vec[None, None, :]).reshape(C, CH)       # block-diagonal (C, C*H)
    b_tiled = jnp.tile(bias.reshape(1, H).astype(jnp.float32), (1, C))  # (1, C*H)
    if CH_pad != CH:
        w_blk = jnp.pad(w_blk, ((0, 0), (0, CH_pad - CH)))
        b_tiled = jnp.pad(b_tiled, ((0, 0), (0, CH_pad - CH)))

    out2d = pl.pallas_call(
        functools.partial(_sine_act_kernel, H=H),
        out_shape=jax.ShapeDtypeStruct((N, CH_pad), out_dtype),
        grid_spec=pltpu.PrefetchScalarGridSpec(
            num_scalar_prefetch=0,
            grid=grid,
            in_specs=[
                pl.BlockSpec((tile_n, C), lambda i, j: (i, 0)),
                pl.BlockSpec((C, tile_ch), lambda i, j: (0, j)),
                pl.BlockSpec((1, tile_ch), lambda i, j: (0, j)),
            ],
            out_specs=pl.BlockSpec((tile_n, tile_ch), lambda i, j: (i, j)),
        ),
        compiler_params=pltpu.CompilerParams(
            dimension_semantics=("parallel", "parallel"),  # megacore-shardable
            vmem_limit_bytes=vmem_limit,
        ),
    )(x2d, w_blk, b_tiled)

    if CH_pad != CH:
        out2d = out2d[:, :CH]
    return out2d.reshape(B, T, CH)


def sine_activation_ref(x, weight, bias):
    # pure-JAX reference with identical semantics to the PyTorch module
    B, T, C = x.shape
    H = weight.shape[0]
    f = x[..., None] * weight.reshape(1, 1, 1, H) + bias.reshape(1, 1, 1, H)
    f = jnp.concatenate([jnp.sin(f[..., :-1]), f[..., -1:]], axis=-1)
    return f.reshape(B, T, C * H)


if __name__ == "__main__":
    keys = jax.random.split(jax.random.PRNGKey(0), 6)

    # Primary shape implied by the module: (batch, seq, features), hidden H = channels[1].
    B, T, C, H = 2, 8, 4, 32
    x = jax.random.normal(keys[0], (B, T, C), dtype=jnp.float32)
    weight = jax.random.normal(keys[1], (H, 1), dtype=jnp.float32) * 0.5
    bias = jax.random.normal(keys[2], (H,), dtype=jnp.float32) * 0.1

    y = jax.block_until_ready(sine_activation(x, weight, bias))
    y_ref = sine_activation_ref(x, weight, bias)
    assert y.shape == (B, T, C * H)
    assert jnp.allclose(y, y_ref, atol=1e-5, rtol=1e-5)

    # Ragged-tail + non-multiple-of-128 C*H check (exercises cdiv grid + lane pad).
    B2, T2, C2, H2 = 3, 5, 3, 7
    x2 = jax.random.normal(keys[3], (B2, T2, C2), dtype=jnp.float32)
    w2 = jax.random.normal(keys[4], (H2, 1), dtype=jnp.float32) * 0.5
    b2 = jax.random.normal(keys[5], (H2,), dtype=jnp.float32) * 0.1
    y2 = jax.block_until_ready(sine_activation(x2, w2, b2))
    assert y2.shape == (B2, T2, C2 * H2)
    assert jnp.allclose(y2, sine_activation_ref(x2, w2, b2), atol=1e-5, rtol=1e-5)

    print("KERNEL_OK")
</pallas_src>

<mosaic_0001>
module attributes {stable_mosaic.version = 11 : i64} {
  func.func @_sine_act_kernel(%arg0: i32, %arg1: i32, %arg2: memref<8x4xf32, #tpu.memory_space<vmem>>, %arg3: memref<4x128xf32, #tpu.memory_space<vmem>>, %arg4: memref<1x128xf32, #tpu.memory_space<vmem>>, %arg5: memref<8x128xf32, #tpu.memory_space<vmem>>) attributes {dimension_semantics = [#tpu.dimension_semantics<parallel>, #tpu.dimension_semantics<parallel>], iteration_bounds = array<i64: 2, 1>, scalar_prefetch = 0 : i64, scratch_operands = 0 : i64, tpu.core_type = #tpu.core_type<tc>, window_params = [{transform_indices = @transform_0, window_bounds = array<i64: 8, 4>}, {transform_indices = @transform_1, window_bounds = array<i64: 4, 128>}, {transform_indices = @transform_2, window_bounds = array<i64: 1, 128>}, {transform_indices = @transform_3, window_bounds = array<i64: 8, 128>}]} {
    %c0 = arith.constant 0 : index
    %c0_0 = arith.constant 0 : index
    %0 = vector.load %arg2[%c0, %c0_0] : memref<8x4xf32, #tpu.memory_space<vmem>>, vector<8x4xf32>
    %c0_1 = arith.constant 0 : index
    %c0_2 = arith.constant 0 : index
    %1 = vector.load %arg3[%c0_1, %c0_2] : memref<4x128xf32, #tpu.memory_space<vmem>>, vector<4x128xf32>
    %cst = arith.constant dense<0.000000e+00> : vector<8x128xf32>
    %2 = tpu.matmul %0, %1, %cst {dimension_numbers = #tpu.dot_dimension_numbers<[1], [0], [0], [1], [0, 0, 1, 1], [], []>, precision = #tpu.contract_precision<fp32>} : vector<8x4xf32>, vector<4x128xf32>, vector<8x128xf32> -> vector<8x128xf32>
    %c0_3 = arith.constant 0 : index
    %c0_4 = arith.constant 0 : index
    %3 = vector.load %arg4[%c0_3, %c0_4] : memref<1x128xf32, #tpu.memory_space<vmem>>, vector<1x128xf32>
    %4 = vector.broadcast %3 : vector<1x128xf32> to vector<8x128xf32>
    %5 = arith.addf %2, %4 : vector<8x128xf32>
    %c128_i32 = arith.constant 128 : i32
    %6 = arith.muli %arg1, %c128_i32 : i32
    %7 = tpu.iota {dimensions = array<i32: 1>} : vector<1x128xi32>
    %8 = vector.broadcast %6 : i32 to vector<1x128xi32>
    %9 = arith.addi %8, %7 : vector<1x128xi32>
    %c32_i32 = arith.constant 32 : i32
    %c0_i32 = arith.constant 0 : i32
    %10 = arith.cmpi eq, %c32_i32, %c0_i32 : i32
    %c1_i32 = arith.constant 1 : i32
    %11 = arith.select %10, %c1_i32, %c32_i32 : i32
    %12 = vector.broadcast %11 : i32 to vector<1x128xi32>
    %13 = arith.remsi %9, %12 : vector<1x128xi32>
    %c0_i32_5 = arith.constant 0 : i32
    %14 = vector.broadcast %c0_i32_5 : i32 to vector<1x128xi32>
    %15 = arith.cmpi ne, %13, %14 : vector<1x128xi32>
    %c0_i32_6 = arith.constant 0 : i32
    %16 = vector.broadcast %c0_i32_6 : i32 to vector<1x128xi32>
    %17 = arith.cmpi slt, %13, %16 : vector<1x128xi32>
    %c0_i32_7 = arith.constant 0 : i32
    %18 = arith.cmpi slt, %11, %c0_i32_7 : i32
    %19 = vector.broadcast %18 : i1 to vector<1x128xi1>
    %20 = vector.broadcast %19 : vector<1x128xi1> to vector<1x128xi1>
    %21 = arith.xori %17, %20 : vector<1x128xi1>
    %22 = arith.andi %21, %15 : vector<1x128xi1>
    %23 = vector.broadcast %11 : i32 to vector<1x128xi32>
    %24 = arith.addi %13, %23 : vector<1x128xi32>
    %25 = arith.select %22, %24, %13 : vector<1x128xi1>, vector<1x128xi32>
    %c31_i32 = arith.constant 31 : i32
    %26 = vector.broadcast %c31_i32 : i32 to vector<1x128xi32>
    %27 = arith.cmpi ne, %25, %26 : vector<1x128xi32>
    %28 = math.sin %5 : vector<8x128xf32>
    %29 = vector.shape_cast %27 : vector<1x128xi1> to vector<1x128xi1>
    %30 = vector.broadcast %29 : vector<1x128xi1> to vector<8x128xi1>
    %31 = arith.select %30, %28, %5 : vector<8x128xi1>, vector<8x128xf32>
    %c0_8 = arith.constant 0 : index
    %c0_9 = arith.constant 0 : index
    %32 = vector.load %arg5[%c0_8, %c0_9] : memref<8x128xf32, #tpu.memory_space<vmem>>, vector<8x128xf32>
    tpu.vector_store %arg5[%c0_8, %c0_9], %31 {strides = array<i32>} : memref<8x128xf32, #tpu.memory_space<vmem>>, vector<8x128xf32>,
    return
  }
  func.func @transform_0(%arg0: i32, %arg1: i32) -> (i32, i32) {
    %c0_i32 = arith.constant 0 : i32
    %c0_i32_0 = arith.constant 0 : i32
    return %arg0, %c0_i32 : i32, i32
  }
  func.func @transform_1(%arg0: i32, %arg1: i32) -> (i32, i32) {
    %c0_i32 = arith.constant 0 : i32
    %c0_i32_0 = arith.constant 0 : i32
    return %c0_i32, %arg1 : i32, i32
  }
  func.func @transform_2(%arg0: i32, %arg1: i32) -> (i32, i32) {
    %c0_i32 = arith.constant 0 : i32
    %c0_i32_0 = arith.constant 0 : i32
    return %c0_i32, %arg1 : i32, i32
  }
  func.func @transform_3(%arg0: i32, %arg1: i32) -> (i32, i32) {
    %c0_i32 = arith.constant 0 : i32
    return %arg0, %arg1 : i32, i32
  }
}

</mosaic_0001>

<bundles_post_ra>
// kernel: tpu_custom_call.1
= control target key start
LH: loop header
LB: loop body
LE: loop exit
PB: predicated region body
PF: predicated region fallthrough
CT: control target
= control target key end

     0   :  { %8 = vsyncpa [#allocation3], 0  ;;  %s1016_s0 = inlined_call_operand.vmem [shape: f32[16,4], index: 0, kind: input, shape index: {}]   ;;  %s1017_s1 = inlined_call_operand.vmem [shape: f32[4,128], index: 1, kind: input, shape index: {}]   ;;  %s1018_s2 = inlined_call_operand.vmem [shape: f32[1,128], index: 2, kind: input, shape index: {}]   ;;  %s1019_s3 = inlined_call_operand.hbm [shape: f32[16,128], index: 3, kind: output, shape index: {}]  }
   0x1   :  { %10 = vsyncpa [#allocation3 + $0x1], 0  ;;  %s846_s12 = smov 0   ;;  %s848_s13 = smov 0  }
   0x2   :  { %s850_s14 = smov 0   ;;  %s852_s15 = smov 0  }
   0x3   :  { %s854_s16 = smov 0   ;;  %s856_s17 = smov 0  }
   0x4 LB: > { %s660_s18 = sadd.s32 4294967295, %s817_s17   ;;  %s661_s19 = sadd.s32 4294967294, %s817_s17   ;;  %s817_s17 = sphi %s856_s17, %s16_s17   ;;  %s813_s16 = sphi %s854_s16, %s1028_s16   ;;  %s809_s15 = sphi %s852_s15, %s1027_s15   ;;  %s805_s14 = sphi %s850_s14, %s1026_s14   ;;  %s801_s13 = sphi %s848_s13, %s1025_s13   ;;  %s797_s12 = sphi %s846_s12, %s1024_s12  }
   0x5   : > { %s28_s20 = sadd.s32 1, %s813_s16  ;;  %s115_s21 = sadd.s32 1, %s805_s14 }
   0x6   : > { %p30_p0 = scmp.ge.s32.totalorder %s28_s20, 2  ;;  %p125_p1 = scmp.ne.s32.totalorder %s805_s14, %s801_s13 }
   0x7   : > { %p126_p2 = scmp.eq.s32.totalorder %s660_s18, 1  ;;  %p131_p3 = scmp.ne.s32.totalorder %s801_s13, %s797_s12 }
   0x8   : > { %s1030_s20 = smov (%p30_p0, %s28_s20), 0  ;;  %p132_p5 = scmp.eq.s32.totalorder %s661_s19, 1 }
   0x9   : > { %p886_p4 = por %p126_p2, %p125_p1  ;;  %s110_s23 = ssub.s32 %s813_s16, %s1030_s20 }
   0xa   : > { %p666_p6 = scmp.ge.s32.totalorder %s817_s17, 1  ;;  %p113_p7 = scmp.eq.s32.totalorder %s110_s23, 0 }
   0xb   : > { %p893_p8 = por %p132_p5, %p131_p3  ;;  %p170_p9 = scmp.lt.s32.totalorder %s817_s17, 3 }
   0xc   : > { %s899_s25 = scalar_select %p113_p7, %s805_s14, %s115_s21  }
   0xd   : > { %p171_p10 = pnand %p666_p6, %p170_p9 }
   0xe   : > { %p200_p11 = scmp.lt.s32.totalorder (!%p171_p10), %s809_s15, 1  ;;  %s197_s8 = sand.u32 (!%p171_p10), 1, %s801_s13  }
   0xf   : > { %174 = sbr.rel (%p171_p10) target bundleno = 274 (0x112), region = 32  ;;  %s667_s9 = sshll.u32 (!%p171_p10), %s197_s8, 3 }
  0x10   : > { %s673_s10 = sshll.u32 (!%p171_p10), %s809_s15, 3  ;;  %s199_s21 = scalar_lea.vmem (!%p171_p10), [#allocation2], %s667_s9 }
  0x11   : > { %s560_s19 = scalar_lea.hbm (!%p171_p10), %s1019_s3, %s673_s10  ;;  %s562_s23 = sshll.u32 (!%p171_p10), %s199_s21, 4  ;;  %s563_s23 = int_to_ptr.vmem [resolvable:$true] %s562_s23 }
  0x12   : > { %s564_s26 = sshll.u32 (!%p171_p10), %s560_s19, 4  ;;  %s759_s4 = scalar_lea.hbm (!%p171_p10), %s1019_s3, 16  ;;  %s565_s26 = int_to_ptr.hbm [resolvable:$true] %s564_s26 }
  0x13   : > { %s753_s27 = sshra.s32 (!%p171_p10), %s565_s26, 4  ;;  %s754_s27 = int_to_ptr.hbm [resolvable:$true] %s753_s27 }
  0x14   : > { %v212_v0 = vld [vmem:[%s1017_s1] sm:$0xf]  ;;  %vm221_vm0 = vcmask 1043456   ;;  %s201_s28 = scalar_select %p200_p11, %s809_s15, 1  ;;  %vm217_vm1 = vcmask 31744  }
  0x15   : > { %v223_v1 = vsel %vm221_vm0, %v212_v0, 0  ;;  %v738_v14 = vld [vmem:[%s1018_s2] ss:$0 sm:$0xff]  ;;  %v819_v38 = vmov 2102212464   ;;  %s549_s15 = scalar_lea.sflag [#allocation3], %s197_s8  ;;  %p760_p1 = scmp.lt.s32.totalorder %s754_s27, %s1019_s3 }
  0x16   : > { %v240_v2 = vand.u32 4294901760, %v223_v1  ;;  %s668_s29 = sshll.u32 %s201_s28, 3  ;;  %v820_v40 = vmov 920167782   ;;  %v821_v43 = vmov 1326507024  }
  0x17   : > { %s203_s5 = scalar_lea.vmem %s1016_s0, %s668_s29  ;;  %v822_v45 = vmov 683565275   ;;  %v823_v47 = vmov 2475754826   ;;  %v824_v50 = vmov 2131351028  }
  0x18   : > { %v267_v3 = vsub.f32 %v223_v1, %v240_v2  ;;  %241 = vmatpush.msra.mxu0 %v240_v2  ;;  %317 = vmatpush.msra.mxu3 %v240_v2  ;;  %v211_v4 = vld [vmem:[%s203_s5] sm:$0xff]  ;;  %s755_s28 = scalar_lea.hbm %s754_s27, 8 }
  0x19   : > { %v219_v6 = vsel %vm217_vm1, %v211_v4, 0  ;;  %p756_p12 = scmp.ne.s32.totalorder %s754_s27, %s755_s28  ;;  %p761_p2 = scmp.lt.s32.totalorder %s759_s4, %s755_s28 }
  0x1a   : > { %294 = vmatpush.msra.mxu2 %v267_v3  ;;  %v268_v5 = vand.u32 4294901760, %v267_v3  ;;  %v242_v7 = vand.u32 4294901760, %v219_v6 }
  0x1b   : > { %p757_p13 = pnand %p756_p12, %p886_p4  ;;  %p762_p3 = por %p761_p2, %p760_p1 }
  0x1c   : > { %343 = vmatpush.msrb.mxu0 %v268_v5  ;;  %v269_v8 = vsub.f32 %v267_v3, %v268_v5  ;;  %v243_v9 = vsub.f32 %v219_v6, %v242_v7 }
  0x1d   : > { %p758_p0 = pneg %p757_p13 }
  0x1e   : > { %v270_v10 = vand.u32 4294901760, %v269_v8  ;;  %297 = vmatmul.f32.vlgmr.msra.gmra.mxu2 %v243_v9  ;;  %v244_v11 = vand.u32 4294901760, %v243_v9 }
  0x1f   : > { %p763_p5 = pnand %p762_p3, %p758_p0 }
  0x20   : > { %271 = vmatpush.msra.mxu1 %v270_v10  ;;  %v245_v12 = vsub.f32 %v243_v9, %v244_v11  ;;  %321 = vmatmul.f32.vlgmr.msra.gmra.mxu3 %v244_v11 }
  0x21   : > { %273 = vmatmul.f32.vlgmr.msra.gmra.mxu1 %v242_v7 }
  0x22   : > { %365 = vmatpush.msrb.mxu1 %v240_v2  ;;  %v246_v13 = vand.u32 4294901760, %v245_v12 }
  0x24   : > { %247 = vmatmul.f32.vlgmr.msra.gmra.mxu0 %v246_v13 }
  0x29   : > { %367 = vmatmul.f32.vlgmr.msrb.gmra.mxu1 %v242_v7 }
  0x2c   : > { %345 = vmatmul.f32.vlgmr.msrb.gmra.mxu0 %v242_v7 }
  0x9e   : > { %v274_v15 = vpop.f32.mrf.mxu1 }
  0xa1   : > { %v248_v16 = vpop.f32.mrf.mxu0  ;;  %v298_v18 = vpop.f32.mrf.mxu2 }
  0xa2   : > { %v249_v17 = vadd.f32 %v738_v14, %v248_v16 }
  0xa3   : > { %v322_v20 = vpop.f32.mrf.mxu3 }
  0xa4   : > { %v275_v19 = vadd.f32 %v274_v15, %v249_v17 }
  0xa6   : > { %v299_v21 = vadd.f32 %v298_v18, %v275_v19  ;;  %v368_v24 = vpop.f32.mrf.mxu1 }
  0xa8   : > { %v323_v22 = vadd.f32 %v322_v20, %v299_v21 }
  0xa9   : > { %v346_v23 = vpop.f32.mrf.mxu0 }
  0xaa   : > { %v347_v25 = vadd.f32 %v346_v23, %v323_v22 }
  0xac   : > { %v912_v26 = vadd.f32 %v368_v24, %v347_v25  ;;  %v825_v24 = vmov 0  }
  0xae   : > { %v392_v27 = vand.u32 2139095040, %v912_v26  ;;  %v389_v30 = vand.u32 2147483647, %v912_v26  ;;  %vm391_vm14 = vcmp.lt.s32.totalorder %v912_v26, 0 }
  0xb0   : > { %v393_v28 = vshrl.u32 %v392_v27, 23  ;;  %v396_v32 = vand.u32 8388607, %v389_v30  ;;  %vm964_vm15 = vcmp.le.f32.partialorder %v389_v30, 0.7853982 }
  0xb2   : > { %v669_v29 = vadd.s32 4294967169, %v393_v28  ;;  %v397_v36 = vor.u32 8388608, %v396_v32 }
  0xb4   : > { %v399_v31 = vadd.s32 1, %v669_v29  ;;  %v927_v57 = vshll.u32 %v397_v36, 8 }
  0xb6   : > { %vm400_vm2 = vcmp.gt.s32.totalorder %v399_v31, 0  ;;  %v438_v3 = vand.u32 65535, %v927_v57  ;;  %v439_v5 = vshrl.u32 %v927_v57, 16 }
  0xb7   : > { %v401_v33 = vsel %vm400_vm2, %v399_v31, 0 }
  0xb8   : > { %v403_v34 = vand.u32 31, %v401_v33  ;;  %v920_v37 = vshrl.u32 %v401_v33, 5 }
  0xba   : > { %v918_v35 = vsub.s32 32, %v403_v34  ;;  %v415_v39 = vshll.u32 %v819_v38, %v403_v34  ;;  %v418_v41 = vshll.u32 %v820_v40, %v403_v34  ;;  %v406_v46 = vshll.u32 %v822_v45, %v403_v34 }
  0xbb   : > { %v409_v49 = vshll.u32 %v823_v47, %v403_v34  ;;  %v412_v52 = vshll.u32 %v824_v50, %v403_v34  ;;  %vm424_vm3 = vcmp.lt.s32.totalorder %v920_v37, 4  ;;  %vm421_vm4 = vcmp.lt.s32.totalorder %v920_v37, 1 }
  0xbc   : > { %v416_v42 = vshrl.u32 %v820_v40, %v918_v35  ;;  %v419_v44 = vshrl.u32 %v821_v43, %v918_v35  ;;  %v407_v48 = vshrl.u32 %v823_v47, %v918_v35  ;;  %v410_v51 = vshrl.u32 %v824_v50, %v918_v35 }
  0xbd   : > { %v413_v53 = vshrl.u32 %v819_v38, %v918_v35  ;;  %vm423_vm5 = vcmp.lt.s32.totalorder %v920_v37, 3  ;;  %vm422_vm6 = vcmp.lt.s32.totalorder %v920_v37, 2  ;;  %v405_v31 = vshrl.u32 %v822_v45, %v918_v35 }
  0xbe   : > { %v417_v54 = vor.u32 %v416_v42, %v415_v39  ;;  %v420_v55 = vor.u32 %v419_v44, %v418_v41  ;;  %v408_v56 = vor.u32 %v407_v48, %v406_v46  ;;  %v411_v58 = vor.u32 %v410_v51, %v409_v49 }
  0xbf   : > { %v414_v59 = vor.u32 %v413_v53, %v412_v52 }
  0xc0   : > { %v430_v60 = vsel %vm424_vm3, %v417_v54, 920167782  ;;  %v434_v61 = vsel %vm424_vm3, %v420_v55, 1326507024  ;;  %v429_v62 = vsel %vm421_vm4, %v408_v56, %v411_v58  ;;  %v425_v39 = vsel %vm421_vm4, %v405_v31, %v408_v56 }
  0xc1   : > { %v431_v63 = vsel %vm423_vm5, %v414_v59, %v430_v60  ;;  %v433_v0 = vsel %vm421_vm4, %v411_v58, %v414_v59  ;;  %v435_v2 = vsel %vm423_vm5, %v417_v54, %v434_v61  ;;  %v426_v27 = vsel %vm424_vm3, %v414_v59, 2102212464 }
  0xc2   : > { %v432_v1 = vsel %vm422_vm6, %v429_v62, %v431_v63  ;;  %v436_v4 = vsel %vm422_vm6, %v433_v0, %v435_v2  ;;  %v427_v40 = vsel %vm423_vm5, %v411_v58, %v426_v27  ;;  %vm532_vm4 = vweird.f32 %v912_v26 }
  0xc3   : > { %v462_v6 = vand.u32 65535, %v432_v1  ;;  %v463_v7 = vshrl.u32 %v432_v1, 16  ;;  %v440_v8 = vand.u32 65535, %v436_v4  ;;  %v441_v9 = vshrl.u32 %v436_v4, 16 }
  0xc4   : > { %v428_v35 = vsel %vm422_vm6, %v425_v39, %v427_v40 }
  0xc5   : > { %v465_v10 = vmul.u32 %v463_v7, %v438_v3  ;;  %v466_v11 = vmul.u32 %v462_v6, %v439_v5  ;;  %v443_v12 = vmul.u32 %v441_v9, %v438_v3  ;;  %v444_v13 = vmul.u32 %v440_v8, %v439_v5 }
  0xc6   : > { %v464_v14 = vmul.u32 %v462_v6, %v438_v3  ;;  %v442_v16 = vmul.u32 %v440_v8, %v438_v3  ;;  %v467_v18 = vmul.u32 %v463_v7, %v439_v5  ;;  %v445_v19 = vmul.u32 %v441_v9, %v439_v5 }
  0xc7   : > { %v468_v15 = vshll.u32 %v465_v10, 16  ;;  %v446_v17 = vshll.u32 %v443_v12, 16  ;;  %v470_v20 = vshll.u32 %v466_v11, 16  ;;  %v448_v22 = vshll.u32 %v444_v13, 16 }
  0xc8   : > { %v469_v36 = vshrl.u32 %v465_v10, 16  ;;  %v447_v41 = vshrl.u32 %v443_v12, 16  ;;  %v471_v43 = vshrl.u32 %v466_v11, 16  ;;  %v449_v46 = vshrl.u32 %v444_v13, 16 }
  0xc9   : > { %vm472_vm7 = vc.u32 %v464_v14, %v468_v15  ;;  %v474_v21 = vadd.s32 %v468_v15, %v464_v14  ;;  %vm450_vm8 = vc.u32 %v442_v16, %v446_v17  ;;  %v452_v23 = vadd.s32 %v446_v17, %v442_v16 }
  0xca   : > { %v473_v25 = vsel %vm472_vm7, 1, %v825_v24  ;;  %v451_v28 = vsel %vm450_vm8, 1, %v825_v24  ;;  %v482_v51 = vmul.u32 %v927_v57, %v428_v35 }
  0xcb   : > { %v475_v29 = vadd.s32 %v473_v25, %v467_v18  ;;  %vm476_vm9 = vc.u32 %v474_v21, %v470_v20  ;;  %v453_v32 = vadd.s32 %v451_v28, %v445_v19  ;;  %vm454_vm10 = vc.u32 %v452_v23, %v448_v22 }
  0xcc   : > { %v477_v33 = vsel %vm476_vm9, 1, %v825_v24  ;;  %v455_v34 = vsel %vm454_vm10, 1, %v825_v24  ;;  %v478_v49 = vadd.s32 %v474_v21, %v470_v20  ;;  %v372_v21 = vlaneseq }
  0xcd   : > { %v479_v38 = vadd.s32 %v477_v33, %v475_v29  ;;  %v457_v42 = vadd.s32 %v455_v34, %v453_v32 }
  0xce   : > { %v373_v28 = vand.u32 127, %v372_v21 }
  0xcf   : > { %v480_v44 = vadd.s32 %v479_v38, %v469_v36  ;;  %v458_v47 = vadd.s32 %v457_v42, %v447_v41 }
  0xd0   : > { %v380_v36 = vand.u32 31, %v373_v28 }
  0xd1   : > { %v481_v45 = vadd.s32 %v480_v44, %v471_v43  ;;  %v459_v48 = vadd.s32 %v458_v47, %v449_v46 }
  0xd2   : > { %vm388_vm2 = vcmp.ne.s32.totalorder %v380_v36, 31 }
  0xd3   : > { %v485_v50 = vadd.s32 1, %v481_v45  ;;  %vm484_vm11 = vc.u32 %v459_v48, %v478_v49  ;;  %v483_v63 = vadd.s32 %v478_v49, %v459_v48 }
  0xd5   : > { %v486_v52 = vsel %vm484_vm11, %v485_v50, %v481_v45 }
  0xd6   : > { %v487_v53 = vadd.s32 %v486_v52, %v482_v51 }
  0xd8   : > { %v488_v54 = vadd.s32 536870912, %v487_v53 }
  0xda   : > { %v489_v55 = vshrl.u32 %v488_v54, 30 }
  0xdc   : > { %v490_v56 = vshll.u32 %v489_v55, 30  ;;  %v513_v13 = vsub.s32 4, %v489_v55 }
  0xde   : > { %v491_v58 = vsub.s32 %v487_v53, %v490_v56  ;;  %v514_v18 = vsel %vm391_vm14, %v513_v13, %v489_v55 }
  0xdf   : > { %v516_v30 = vsel %vm964_vm15, 0, %v514_v18 }
  0xe0   : > { %vm492_vm12 = vcmp.lt.s32.totalorder %v491_v58, 0  ;;  %v493_v59 = vsub.s32 0, %v491_v58  ;;  %v533_v27 = vadd.s32 3, %v516_v30 }
  0xe2   : > { %v494_v60 = vsel %vm492_vm12, %v493_v59, %v491_v58  ;;  %v534_v34 = vand.u32 3, %v533_v27 }
  0xe3   : > { %v495_v61 = vclz %v494_v60 }
  0xe4   : > { %vm536_vm0 = vcmp.eq.s32.totalorder %v534_v34, 0  ;;  %vm539_vm1 = vcmp.eq.s32.totalorder %v534_v34, 2  ;;  %vm535_vm3 = vcmp.lt.s32.totalorder %v534_v34, 2 }
  0xe5   : > { %v670_v62 = vadd.s32 4294967294, %v495_v61 }
  0xe7   : > { %vm671_vm13 = vcmp.lt.s32.totalorder %v670_v62, 0 }
  0xe8   : > { %v498_v37 = vsel %vm671_vm13, 0, %v670_v62 }
  0xe9   : > { %v499_v0 = vsub.s32 32, %v498_v37  ;;  %v503_v1 = vsub.s32 4294967266, %v498_v37  ;;  %v500_v2 = vshll.u32 %v491_v58, %v498_v37 }
  0xeb   : > { %v501_v3 = vshrl.u32 %v483_v63, %v499_v0  ;;  %v504_v57 = vadd.s32 127, %v503_v1 }
  0xed   : > { %v502_v4 = vor.u32 %v501_v3, %v500_v2  ;;  %v505_v5 = vshll.u32 %v504_v57, 23 }
  0xef   : > { %v506_v6 = vor.u32 4788187, %v505_v5  ;;  %v509_v8 = vcvt.s32.f32 %v502_v4 }
  0xf1   : > { %v507_v7 = vand.u32 2147483647, %v506_v6 }
  0xf3   : > { %v510_v9 = vmul.f32 %v509_v8, %v507_v7 }
  0xf5   : > { %v511_v10 = vxor.u32 2147483648, %v510_v9 }
  0xf7   : > { %v512_v12 = vsel %vm391_vm14, %v511_v10, %v510_v9 }
  0xf8   : > { %v515_v14 = vsel %vm964_vm15, %v912_v26, %v512_v12 }
  0xf9   : > { %v517_v15 = vmul.f32 %v515_v14, %v515_v14 }
  0xfb   : > { %v518_v16 = vmul.f32 -0.001358992, %v517_v15  ;;  %v525_v17 = vmul.f32 -0.00019511016, %v517_v15 }
  0xfd   : > { %v519_v19 = vadd.f32 0.041655596, %v518_v16  ;;  %v526_v20 = vadd.f32 0.008332121, %v525_v17 }
  0xff   : > { %v520_v22 = vmul.f32 %v519_v19, %v517_v15  ;;  %v527_v23 = vmul.f32 %v526_v20, %v517_v15 }
 0x101   : > { %v521_v24 = vadd.f32 -0.4999988, %v520_v22  ;;  %v528_v25 = vadd.f32 -0.16666654, %v527_v23 }
 0x103   : > { %v522_v29 = vmul.f32 %v521_v24, %v517_v15  ;;  %v529_v31 = vmul.f32 %v528_v25, %v517_v15 }
 0x105   : > { %v523_v32 = vadd.f32 1.0, %v522_v29  ;;  %v530_v33 = vadd.f32 1.0, %v529_v31 }
 0x107   : > { %v531_v38 = vmul.f32 %v530_v33, %v515_v14  ;;  %v540_v39 = vxor.u32 2147483648, %v523_v32 }
 0x109   : > { %v537_v40 = vxor.u32 2147483648, %v531_v38  ;;  %v541_v42 = vsel %vm539_vm1, %v540_v39, %v531_v38 }
 0x10b   : > { %v538_v41 = vsel %vm536_vm0, %v523_v32, %v537_v40 }
 0x10c   : > { %v542_v43 = vsel %vm535_vm3, %v538_v41, %v541_v42 }
 0x10d   : > { %v543_v44 = vsel %vm532_vm4, nan, %v542_v43 }
 0x10e   : > { %v546_v46 = vsel %vm388_vm2, %v543_v44, %v912_v26 }
 0x10f   : > { %547 = vst [vmem:[%s199_s21] sm:$0xff] %v546_v46 }
 0x110   : > { %766 = shalt.err (!%p763_p5)
}
 0x111   : > { %676 = dma.vmem_to_hbm [thread:$0]  (%p886_p4), %s563_s23, 128, %s565_s26, %s549_s15  }
 0x112 PF: > { %p682_p6 = scmp.ge.s32.totalorder %s817_s17, 2  ;;  %s576_s7 = sand.u32 1, %s797_s12  }
 0x113   : > { %s577_s8 = scalar_lea.sflag [#allocation3], %s576_s7 }
 0x114   : > { %p679_p7 = pnand %p682_p6, %p893_p8 }
 0x116   : > { %p680_p9 = pneg %p679_p7 }
 0x118   : > { %792 = dma.done.wait (%p680_p9), %s577_s8, 128  }
 0x119   : > { %794 = vsyncadd (%p680_p9), %s577_s8, 4294967168  ;;  %s16_s17 = sadd.s32 1, %s817_s17   ;;  %s1024_s12 = smov %s801_s13 }
 0x11a   : > { %p13_p10 = scmp.ge.s32.totalorder %s16_s17, 4   ;;  %s1025_s13 = smov %s805_s14 }
 0x11b   : > { %s1026_s14 = smov %s899_s25  ;;  %s1027_s15 = smov %s813_s16 }
 0x11c   : > { %s1028_s16 = smov %s1030_s20  ;;  %15 = sbr.rel (!%p13_p10) target bundleno = 4 (0x4), region = 73 }
 0x121   :  { %583 = vsyncpa [#allocation3], 1 }
 0x122   :  { %585 = vsyncpa [#allocation3 + $0x1], 1 }

</bundles_post_ra>
